<compile_context>
chip_gen: v7x
topology: tpu7x:2x2x1
jax: 0.10.0
libtpu: 0.0.40
codegen_flags: <defaults>
</compile_context>

<pallas_src>
import jax
import jax.numpy as jnp
from jax.experimental import pallas as pl
from jax.experimental.pallas import tpu as pltpu


def _round_up(v, m):
    return (v + m - 1) // m * m


def _patch_embed_kernel(x_ref, w_ref, o_ref):
    """One row-tile grid step.

    x_ref : (TR, K)      K = C*P, lane-dense contraction axis
    w_ref : (K, H_pad)   full projection weight, VMEM resident
    o_ref : (TR, H_pad)  lane-dense output tile
    """
    o_ref[...] = jnp.dot(
        x_ref[...], w_ref[...], preferred_element_type=jnp.float32
    ).astype(o_ref.dtype)


def _vmem_limit_bytes(need_bytes):
    """Generation-aware VMEM cap (v7x = 64 MiB physical, v5e/v6e = 128 MiB)."""
    try:
        cap = int(pltpu.get_tpu_info().vmem_capacity_bytes)
    except Exception:  # e.g. interpret mode / no TPU info available
        cap = 64 << 20  # conservative: assume v7x
    limit = min(max(need_bytes + (4 << 20), 16 << 20), (cap * 3) // 4)
    return int(max(limit, need_bytes + (1 << 20)))


def linear_patch_embedding(x, weight, patch_size, *, tile_rows=1024,
                           compute_dtype=None):
    """x: (N, C, L), weight: (H, C, P) -> (N, L // P, H).

    Equivalent to nn.Conv1d(C, H, kernel_size=P, stride=P, bias=False)
    followed by .flatten(2).transpose(1, 2).
    """
    n, c, length = x.shape
    h, wc, wp = weight.shape
    p = patch_size
    assert wc == c and wp == p, "weight shape must be (H, C, P)"
    assert length % p == 0, "length must be divisible by patch_size"
    assert tile_rows % 8 == 0, "tile_rows must be a multiple of 8"
    num_patches = length // p
    out_dtype = x.dtype

    # Low-precision input streaming by default (accumulation stays f32).
    if compute_dtype is None:
        compute_dtype = jnp.bfloat16 if x.dtype == jnp.float32 else x.dtype

    k = c * p                       # combined contraction axis
    r = n * num_patches             # flattened row axis
    h_pad = _round_up(h, 128)       # lane-dense output (no-op for H=256)

    # One-time HBM relayout of x: (N, C, L) -> (R, K) with K laid out as
    # (channel-major, patch-element-minor) to match the weight flattening.
    xc = x.astype(compute_dtype)
    x_mat = (
        xc.reshape(n, c, num_patches, p)
        .transpose(0, 2, 1, 3)
        .reshape(r, k)
    )

    # Tiny weight relayout: (H, C, P) -> (K, H_pad).
    w_mat = jnp.transpose(weight.astype(compute_dtype), (1, 2, 0)).reshape(k, h)
    if h_pad != h:
        w_mat = jnp.pad(w_mat, ((0, 0), (0, h_pad - h)))

    # Row-tile selection: full axis if tiny, otherwise keep >=2 grid steps so
    # both v7x TensorCores (and the pipeline) have work.
    if r <= 16:
        tr = r
    elif r <= tile_rows:
        tr = _round_up(pl.cdiv(r, 2), 8)
    else:
        tr = tile_rows
    grid = (pl.cdiv(r, tr),)

    in_itemsize = jnp.dtype(compute_dtype).itemsize
    out_itemsize = jnp.dtype(out_dtype).itemsize
    flops = 2 * r * k * h_pad
    bytes_accessed = (
        r * k * in_itemsize            # x read once
        + k * h_pad * in_itemsize      # weight (resident)
        + r * h_pad * out_itemsize     # output write
    )
    # VMEM need using *padded* block bytes: double-buffered x and out tiles,
    # plus the (conservatively double-buffered) resident weight.
    k_lanes = _round_up(k, 128)
    tr_sub = _round_up(tr, 8)
    need = (
        2 * tr_sub * k_lanes * in_itemsize
        + 2 * _round_up(k, 16) * h_pad * in_itemsize
        + 2 * tr_sub * h_pad * out_itemsize
    )

    out_mat = pl.pallas_call(
        _patch_embed_kernel,
        out_shape=jax.ShapeDtypeStruct((r, h_pad), out_dtype),
        grid=grid,
        in_specs=[
            # x: (R, K) -> kernel block (TR, K), lane-dense contraction axis
            pl.BlockSpec((tr, k), lambda i: (i, 0)),
            # weight: constant index map -> fetched once, VMEM-resident
            pl.BlockSpec((k, h_pad), lambda i: (0, 0)),
        ],
        out_specs=pl.BlockSpec((tr, h_pad), lambda i: (i, 0)),
        compiler_params=pltpu.CompilerParams(
            dimension_semantics=("parallel",),
            vmem_limit_bytes=_vmem_limit_bytes(need),
        ),
        cost_estimate=pl.CostEstimate(
            flops=flops, transcendentals=0, bytes_accessed=bytes_accessed
        ),
    )(x_mat, w_mat)

    # Strip hidden-dim padding (no-op when H is already a multiple of 128,
    # e.g. the real H=256 config) and restore (N, num_patches, H).
    if h_pad != h:
        out_mat = out_mat[:, :h]
    return out_mat.reshape(n, num_patches, h)


def _reference(x, weight, patch_size):
    """Pure-JAX reference mirroring the PyTorch forward (strided conv1d)."""
    out = jax.lax.conv_general_dilated(
        x,        # (N, C, L)
        weight,   # (H, C, P)
        window_strides=(patch_size,),
        padding="VALID",
        dimension_numbers=("NCH", "OIH", "NCH"),
    )  # (N, H, num_patches)
    return jnp.transpose(out, (0, 2, 1))  # (N, num_patches, H)


if __name__ == "__main__":
    # Small, deterministic setup consistent with the module:
    # batch=2, channels=4, patch_size=8, length=128 (-> 16 patches), hidden=32.
    batch, channels, patch_size, num_patches, hidden = 2, 4, 8, 16, 32
    length = patch_size * num_patches

    key = jax.random.PRNGKey(0)
    kx, kw = jax.random.split(key)
    x = jax.random.normal(kx, (batch, channels, length), dtype=jnp.float32)
    # Deterministic "conv" weight, shape (num_hiddens, num_channels, patch_size)
    weight = (
        jax.random.normal(kw, (hidden, channels, patch_size), dtype=jnp.float32)
        * 0.02
    )

    ref = jax.block_until_ready(_reference(x, weight, patch_size))

    # 1) Exact f32 path (multi-step grid via the >=2-step heuristic).
    out_f32 = jax.block_until_ready(
        linear_patch_embedding(x, weight, patch_size, compute_dtype=jnp.float32)
    )
    assert out_f32.shape == (batch, num_patches, hidden), out_f32.shape
    assert jnp.allclose(out_f32, ref, atol=2e-5, rtol=2e-5), "f32 mismatch"

    # 2) Ragged row-tiling (last grid step is a partial block).
    out_rag = jax.block_until_ready(
        linear_patch_embedding(x, weight, patch_size, tile_rows=24,
                               compute_dtype=jnp.float32)
    )
    assert jnp.allclose(out_rag, ref, atol=2e-5, rtol=2e-5), "ragged mismatch"

    # 3) Default bf16 streaming path (f32 accumulation in the MXU).
    out_bf16 = jax.block_until_ready(
        linear_patch_embedding(x, weight, patch_size)
    )
    assert out_bf16.shape == (batch, num_patches, hidden), out_bf16.shape
    assert jnp.allclose(out_bf16, ref, atol=1e-2, rtol=1e-2), "bf16 mismatch"

    print("KERNEL_OK")
</pallas_src>

<mosaic_0001>
module attributes {stable_mosaic.version = 11 : i64} {
  func.func @_patch_embed_kernel(%arg0: i32, %arg1: memref<16x32xf32, #tpu.memory_space<vmem>>, %arg2: memref<32x128xf32, #tpu.memory_space<vmem>>, %arg3: memref<16x128xf32, #tpu.memory_space<vmem>>) attributes {dimension_semantics = [#tpu.dimension_semantics<parallel>], iteration_bounds = array<i64: 2>, scalar_prefetch = 0 : i64, scratch_operands = 0 : i64, tpu.core_type = #tpu.core_type<tc>, window_params = [{transform_indices = @transform_0, window_bounds = array<i64: 16, 32>}, {pipeline_mode = #tpu.pipeline_mode<synchronous>, transform_indices = @transform_1, window_bounds = array<i64: 32, 128>}, {transform_indices = @transform_2, window_bounds = array<i64: 16, 128>}]} {
    %c0 = arith.constant 0 : index
    %c0_0 = arith.constant 0 : index
    %0 = vector.load %arg1[%c0, %c0_0] : memref<16x32xf32, #tpu.memory_space<vmem>>, vector<16x32xf32>
    %c0_1 = arith.constant 0 : index
    %c0_2 = arith.constant 0 : index
    %1 = vector.load %arg2[%c0_1, %c0_2] : memref<32x128xf32, #tpu.memory_space<vmem>>, vector<32x128xf32>
    %cst = arith.constant dense<0.000000e+00> : vector<16x128xf32>
    %2 = tpu.matmul %0, %1, %cst {dimension_numbers = #tpu.dot_dimension_numbers<[1], [0], [0], [1], [0, 0, 1, 1], [], []>} : vector<16x32xf32>, vector<32x128xf32>, vector<16x128xf32> -> vector<16x128xf32>
    %c0_3 = arith.constant 0 : index
    %c0_4 = arith.constant 0 : index
    %3 = vector.load %arg3[%c0_3, %c0_4] : memref<16x128xf32, #tpu.memory_space<vmem>>, vector<16x128xf32>
    tpu.vector_store %arg3[%c0_3, %c0_4], %2 {strides = array<i32>} : memref<16x128xf32, #tpu.memory_space<vmem>>, vector<16x128xf32>,
    return
  }
  func.func @transform_0(%arg0: i32) -> (i32, i32) {
    %c0_i32 = arith.constant 0 : i32
    %c0_i32_0 = arith.constant 0 : i32
    return %arg0, %c0_i32 : i32, i32
  }
  func.func @transform_1(%arg0: i32) -> (i32, i32) {
    %c0_i32 = arith.constant 0 : i32
    %c0_i32_0 = arith.constant 0 : i32
    %c0_i32_1 = arith.constant 0 : i32
    return %c0_i32, %c0_i32_0 : i32, i32
  }
  func.func @transform_2(%arg0: i32) -> (i32, i32) {
    %c0_i32 = arith.constant 0 : i32
    %c0_i32_0 = arith.constant 0 : i32
    return %arg0, %c0_i32 : i32, i32
  }
}

</mosaic_0001>

<bundles_post_ra>
// kernel: tpu_custom_call.1
= control target key start
LH: loop header
LB: loop body
LE: loop exit
PB: predicated region body
PF: predicated region fallthrough
CT: control target
= control target key end

     0   :  { %7 = vsyncpa [#allocation3], 0  ;;  %s831_s0 = inlined_call_operand.hbm [shape: f32[32,32], index: 0, kind: input, shape index: {}]   ;;  %s832_s1 = inlined_call_operand.hbm [shape: f32[32,128], index: 1, kind: input, shape index: {}]   ;;  %s833_s2 = inlined_call_operand.hbm [shape: f32[32,128], index: 2, kind: output, shape index: {}]  }
   0x1   :  { %9 = vsyncpa [#allocation3 + $0x1], 0 }
   0x2   :  { %10 = vsyncpa [#allocation6], 0 }
   0x3   :  { %11 = vsyncpa [#allocation4], 0 }
   0x4   :  { %13 = vsyncpa [#allocation4 + $0x1], 0  ;;  %s624_s9 = smov 0   ;;  %s626_s10 = smov 0  }
   0x5   :  { %s628_s11 = smov 0   ;;  %s630_s12 = smov 0  }
   0x6 LB: > { %s645_s13 = sadd.s32 4294967295, %s600_s12   ;;  %s366_s14 = sadd.s32 4294967294, %s600_s12   ;;  %s600_s12 = sphi %s630_s12, %s853_s12   ;;  %s596_s11 = sphi %s628_s11, %s852_s11   ;;  %s592_s10 = sphi %s626_s10, %s851_s10   ;;  %s588_s9 = sphi %s624_s9, %s850_s9  }
   0x7   : > { %p39_p0 = scmp.ne.s32.totalorder %s592_s10, %s588_s9  ;;  %p834_p1 = scmp.eq.s32.totalorder %s645_s13, 0 }
   0x8   : > { %p90_p3 = scmp.eq.s32.totalorder %s366_s14, 1  ;;  %p367_p5 = scmp.ge.s32.totalorder %s600_s12, 1 }
   0x9   : > { %p654_p4 = por %p834_p1, %p39_p0  ;;  %p97_p7 = scmp.lt.s32.totalorder %s600_s12, 3 }
   0xa   : > { %p659_p6 = por %p90_p3, %p39_p0  ;;  %s602_s18 = smov [#allocation5]  }
   0xb   : > { %s837_s15 = scalar_select %p654_p4, 1, 0 }
   0xc   : > { %s838_s16 = scalar_select %p659_p6, 1, 0 }
   0xd   : > { %p664_p8 = pnand %p367_p5, %p97_p7  ;;  %s109_s19 = sshll.u32 %s602_s18, 4  ;;  %s668_s19 = int_to_ptr.vmem [resolvable:$true] %s109_s19 }
   0xe   : > { %s680_s21 = sadd.s32 1, %s600_s12   ;;  %s26_s22 = sadd.s32 1, %s596_s11 }
   0xf   : > { %s839_s17 = scalar_select %p664_p8, 1, 0 }
  0x10   : > { %p419_p9 = pneg %p664_p8  ;;  %s23_s23 = ssub.s32 %s600_s12, %s680_s21 }
  0x11   : > { %s472_s26 = scalar_lea.hbm %s832_s1, 512 }
  0x12   : > { %p675_p11 = pnand %p419_p9, %p834_p1  ;;  %p473_p12 = scmp.ne.s32.totalorder %s832_s1, %s472_s26 }
  0x13   : > { %p479_p5 = scmp.lt.u32.totalorder %s472_s26, %s832_s1 }
  0x14   : > { %p474_p13 = pneg %p675_p11 }
  0x16   : > { %p475_p0 = pnand %p474_p13, %p473_p12 }
  0x18   : > { %p476_p3 = pneg %p475_p0 }
  0x1a   : > { %p481_p7 = pnand %p479_p5, %p476_p3 }
  0x1c   : > { %484 = shalt.err (!%p481_p7)
}
  0x1d   : > { %s485_s3 = scalar_lea.vmem %s668_s19, 512  ;;  %p493_p2 = scmp.lt.s32.totalorder %s668_s19, %s668_s19 }
  0x1e   : > { %p486_p9 = scmp.ne.s32.totalorder %s668_s19, %s485_s3  ;;  %p494_p6 = scmp.lt.s32.totalorder %s485_s3, %s485_s3 }
  0x20   : > { %p488_p10 = pnand %p486_p9, %p474_p13  ;;  %p495_p4 = por %p494_p6, %p493_p2 }
  0x22   : > { %p489_p1 = pneg %p488_p10 }
  0x24   : > { %p496_p8 = pnand %p495_p4, %p489_p1 }
  0x26   : > { %499 = shalt.err (!%p496_p8)
}
  0x27   : > { %s603_s4 = smov 128   ;;  %s604_s5 = smov 8  }
  0x28   : > { %422 = dma.hbm_to_vmem [thread:$0]  (!%p675_p11), %s832_s1, 512, %s668_s19, [#allocation6], %s603_s4, %s603_s4, %s604_s5  }
  0x29   : > { %p24_p1 = scmp.eq.s32.totalorder %s23_s23, 0  ;;  %p33_p2 = scmp.ne.s32.totalorder %s596_s11, %s592_s10 }
  0x2a   : > { %p34_p4 = scmp.eq.s32.totalorder %s600_s12, 0  ;;  %p432_p6 = scmp.lt.s32.totalorder %s600_s12, 2 }
  0x2b   : > { %s714_s8 = scalar_select %p24_p1, %s596_s11, %s26_s22  }
  0x2c   : > { %p35_p8 = por %p34_p4, %p33_p2  ;;  %p841_p10 = scmp.eq.s32.totalorder %s645_s13, 1 }
  0x2d   : > { %s123_s18 = sand.u32 1, %s596_s11   ;;  %s384_s20 = sshll.u32 %s600_s12, 8 }
  0x2e   : > { %p718_p12 = por %p841_p10, %p33_p2  ;;  %s370_s24 = sshll.u32 %s123_s18, 4 }
  0x2f   : > { %s727_s27 = scalar_lea.hbm %s831_s0, %s384_s20  ;;  %s127_s19 = scalar_lea.vmem [#allocation2], %s370_s24 }
  0x30   : > { %s134_s22 = sshll.u32 %s127_s19, 4  ;;  %p729_p11 = pnand %p432_p6, %p35_p8  ;;  %s733_s22 = int_to_ptr.vmem [resolvable:$true] %s134_s22 }
  0x31   : > { %s735_s28 = scalar_lea.sflag [#allocation3], %s123_s18  ;;  %s500_s29 = scalar_lea.hbm %s727_s27, 256 }
  0x32   : > { %p501_p13 = scmp.ne.s32.totalorder %s727_s27, %s500_s29  ;;  %p502_p0 = pneg %p729_p11 }
  0x33   : > { %s505_s6 = scalar_lea.hbm %s831_s0, 512  ;;  %p506_p7 = scmp.lt.u32.totalorder %s727_s27, %s831_s0 }
  0x34   : > { %p503_p3 = pnand %p502_p0, %p501_p13  ;;  %p507_p9 = scmp.lt.u32.totalorder %s505_s6, %s500_s29 }
  0x35   : > { %p509_p2 = scmp.lt.u32.totalorder %s500_s29, %s727_s27 }
  0x36   : > { %p504_p5 = pneg %p503_p3  ;;  %p508_p1 = por %p507_p9, %p506_p7 }
  0x38   : > { %p510_p4 = por %p509_p2, %p508_p1 }
  0x3a   : > { %p511_p6 = pnand %p510_p4, %p504_p5 }
  0x3c   : > { %514 = shalt.err (!%p511_p6)
}
  0x3d   : > { %s515_s18 = scalar_lea.vmem %s733_s22, 256  ;;  %s605_s24 = smov [#allocation2]  }
  0x3e   : > { %p516_p8 = scmp.ne.s32.totalorder %s733_s22, %s515_s18  ;;  %s520_s25 = sshll.u32 %s605_s24, 4  ;;  %s521_s25 = int_to_ptr.vmem [resolvable:$false] %s520_s25 }
  0x3f   : > { %s522_s26 = scalar_lea.vmem %s521_s25, 512  ;;  %p523_p3 = scmp.lt.s32.totalorder %s733_s22, %s521_s25 }
  0x40   : > { %p518_p10 = pnand %p516_p8, %p502_p0  ;;  %p524_p7 = scmp.lt.s32.totalorder %s522_s26, %s515_s18 }
  0x42   : > { %p519_p13 = pneg %p518_p10  ;;  %p525_p9 = por %p524_p7, %p523_p3 }
  0x44   : > { %p526_p1 = pnand %p525_p9, %p519_p13 }
  0x46   : > { %529 = shalt.err (!%p526_p1)
}
  0x47   : > { %426 = dma.hbm_to_vmem [thread:$0]  (!%p729_p11), %s727_s27, 256, %s733_s22, %s735_s28, %s603_s4, %s603_s4, %s604_s5  }
  0x48   : > { %p844_p0 = scmp.ne.s32.totalorder %s839_s17, 0 }
  0x49   : > { %s769_s19 = sand.u32 (!%p844_p0), 1, %s592_s10   ;;  %p845_p5 = scmp.ne.s32.totalorder (!%p844_p0), %s837_s15, 0 }
  0x4a   : > { %146 = sbr.rel (%p844_p0) target bundleno = 324 (0x144), region = 28  ;;  %s374_s29 = sshll.u32 (!%p844_p0), %s769_s19, 4 }
  0x4b   : > { %s149_s30 = scalar_lea.sflag (!%p844_p0), [#allocation3], %s769_s19  ;;  %s152_s3 = scalar_lea.vmem (!%p844_p0), [#allocation2], %s374_s29 }
  0x51   : > { %575 = dma.done.wait (%p845_p5), %s149_s30, 256  }
  0x52   : > { %577 = vsyncadd (%p845_p5), %s149_s30, 4294967040  ;;  %p846_p2 = scmp.eq.s32.totalorder %s645_s13, 0 }
  0x54   : > { %579 = dma.done.wait (%p846_p2), [#allocation6], 512   ;;  %p847_p11 = pmov %p846_p2 }
  0x55   : > { %vm185_vm0 = vcmask 261120   ;;  %v181_v0 = vld [vmem:[#allocation5] sm:$0xff]  ;;  %v182_v1 = vld [vmem:[#allocation5 + $0x8] sm:$0xff]  ;;  %v183_v2 = vld [vmem:[#allocation5 + $0x10] sm:$0xff]  ;;  %s176_s15 = scalar_lea.vmem [#allocation7], %s374_s29  ;;  %s385_s4 = sshll.u32 %s645_s13, 8 }
  0x56   : > { %581 = vsyncadd (%p847_p11), [#allocation6], 4294966784  ;;  %v403_v3 = vpack.c.bf16 %v182_v1, %v181_v0  ;;  %v184_v4 = vld [vmem:[#allocation5 + $0x18] sm:$0xff]  ;;  %v179_v5 = vld [vmem:[%s152_s3] sm:$0xff]  ;;  %s283_s17 = sshll.u32 %s176_s15, 4  ;;  %s787_s22 = scalar_lea.hbm %s833_s2, %s385_s4  ;;  %s782_s17 = int_to_ptr.vmem [resolvable:$true] %s283_s17 }
  0x57   : > { %v407_v6 = vpack.c.bf16 %v184_v4, %v183_v2  ;;  %400 = vmatprep.mubr.msk.f32.mxu0 %vm185_vm0, %v179_v5  ;;  %v180_v7 = vld [vmem:[%s152_s3 + $0x8] sm:$0xff]  ;;  %s270_s23 = scalar_lea.sflag [#allocation4], %s769_s19  ;;  %s530_s28 = scalar_lea.vmem %s782_s17, 256 }
  0x58   : > { %404 = vmatprep.subr.bf16.mxu0 %v403_v3  ;;  %p531_p4 = scmp.ne.s32.totalorder %s782_s17, %s530_s28  ;;  %s606_s13 = smov [#allocation7]  }
  0x59   : > { %406 = vmatpush3.bf16.msra.mxu0 %v403_v3  ;;  %s534_s6 = sshll.u32 %s606_s13, 4  ;;  %s535_s6 = int_to_ptr.vmem [resolvable:$false] %s534_s6 }
  0x5a   : > { %408 = vmatprep.subr.bf16.mxu0 %v407_v6  ;;  %p532_p6 = pnand %p531_p4, %p718_p12  ;;  %s536_s7 = scalar_lea.vmem %s535_s6, 512 }
  0x5b   : > { %p537_p10 = scmp.lt.s32.totalorder %s782_s17, %s535_s6  ;;  %p538_p13 = scmp.lt.s32.totalorder %s536_s7, %s530_s28 }
  0x5c   : > { %p533_p8 = pneg %p532_p6 }
  0x5d   : > { %410 = vmatpush3.bf16.msra.mxu0 %v407_v6  ;;  %p539_p3 = por %p538_p13, %p537_p10 }
  0x5f   : > { %p540_p7 = pnand %p539_p3, %p533_p8 }
  0x60   : > { %401 = vmatmul.mubr.msk.f32.vlgmr.msra.gmra.mrb[0].mxu0 %vm185_vm0, %v180_v7 }
 0x133   : > { %v402_v8 = vpop.f32.mrb[0].mxu0 }
 0x134   : > { %268 = vst [vmem:[%s176_s15 + $0x8] sm:$0xff] %v402_v8  ;;  %v258_v9 = vpop.f32.mrb[1].mxu0 }
 0x135   : > { %267 = vst [vmem:[%s176_s15] sm:$0xff] %v258_v9 }
 0x136   : > { %543 = shalt.err (!%p540_p7)
}
 0x137   : > { %s544_s20 = scalar_lea.hbm %s787_s22, 256  ;;  %s548_s25 = scalar_lea.hbm %s833_s2, 512 }
 0x138   : > { %p545_p9 = scmp.ne.s32.totalorder %s787_s22, %s544_s20  ;;  %p549_p5 = scmp.lt.u32.totalorder %s787_s22, %s833_s2 }
 0x139   : > { %p550_p2 = scmp.lt.u32.totalorder %s548_s25, %s544_s20  ;;  %p552_p4 = scmp.lt.u32.totalorder %s544_s20, %s787_s22 }
 0x13a   : > { %p546_p1 = pnand %p545_p9, %p718_p12 }
 0x13b   : > { %p551_p11 = por %p550_p2, %p549_p5 }
 0x13c   : > { %p547_p0 = pneg %p546_p1 }
 0x13d   : > { %p553_p6 = por %p552_p4, %p551_p11 }
 0x13f   : > { %p554_p8 = pnand %p553_p6, %p547_p0 }
 0x141   : > { %557 = shalt.err (!%p554_p8)
}
 0x142   : > { %s607_s30 = smov 128   ;;  %s608_s3 = smov 8  }
 0x143   : > { %417 = dma.vmem_to_hbm [thread:$0]  (%p718_p12), %s782_s17, 256, %s787_s22, %s270_s23, %s607_s30, %s607_s30, %s608_s3  }
 0x144 PF: > { %s298_s15 = sand.u32 1, %s588_s9   ;;  %p848_p10 = scmp.ne.s32.totalorder %s838_s16, 0 }
 0x145   : > { %p849_p13 = scmp.ge.s32.totalorder %s600_s12, 2  ;;  %s299_s4 = scalar_lea.sflag [#allocation4], %s298_s15 }
 0x147   : > { %p428_p3 = pnand %p849_p13, %p848_p10 }
 0x149   : > { %583 = dma.done.wait (!%p428_p3), %s299_s4, 256  }
 0x14a   : > { %585 = vsyncadd (!%p428_p3), %s299_s4, 4294967040  ;;  %p16_p7 = scmp.ge.s32.totalorder %s680_s21, 4   ;;  %s850_s9 = smov %s592_s10 }
 0x14b   : > { %s851_s10 = smov %s596_s11  ;;  %s852_s11 = smov %s714_s8 }
 0x14c   : > { %s853_s12 = smov %s680_s21  ;;  %18 = sbr.rel (!%p16_p7) target bundleno = 6 (0x6), region = 77 }
 0x153   :  { %304 = vsyncpa [#allocation3], 1 }
 0x154   :  { %306 = vsyncpa [#allocation3 + $0x1], 1 }
 0x155   :  { %307 = vsyncpa [#allocation6], 1 }
 0x156   :  { %308 = vsyncpa [#allocation4], 1 }
 0x157   :  { %310 = vsyncpa [#allocation4 + $0x1], 1 }

</bundles_post_ra>
